<compile_context>
chip_gen: v7x
topology: tpu7x:2x2x1
jax: 0.10.0
libtpu: 0.0.40
codegen_flags: <defaults>
</compile_context>

<pallas_src>
import jax
import jax.numpy as jnp
from jax.experimental import pallas as pl
from jax.experimental.pallas import tpu as pltpu

# ---- model config (small, consistent with a Qwen1.5-style decoder layer) ----
B = 2          # batch
S = 8          # sequence length
H = 32         # hidden size
NH = 2         # num attention heads
NKV = 2        # num key/value heads (GQA)
D = H // NH    # head dim = 16
I = 64         # MLP intermediate size
EPS = 1e-6
ROPE_BASE = 10000.0
NEG = -1e9

QW = NH * D          # q width  = 32
KW = NKV * D         # k/v width = 32
QKVW = QW + 2 * KW   # fused qkv width = 96
GROUP = NH // NKV

# merged lane-dense output slab: [hidden_out | present_k | present_v | pad] -> 128 lanes
OUT_W = 128
OUT_PAD = OUT_W - (H + 2 * KW)

# packed weight-slab row offsets (all sublane(8)-aligned), width 128 lanes
SLAB_W = 128
R_WQKV = 0                 # (H, QKVW)
R_WGU = R_WQKV + H         # (H, 2I)
R_WO = R_WGU + H           # (QW, H)
R_WD = R_WO + QW           # (I, H)
R_BQKV = R_WD + I          # (1, QKVW)
R_LN = R_BQKV + 8          # (1, 2H): [ln1 | ln2]
SLAB_ROWS = R_LN + 8       # = 176


def _rmsnorm(x, w):
    # Qwen2RMSNorm: x * rsqrt(mean(x^2) + eps) * weight   (all float32 here)
    var = jnp.mean(x * x, axis=-1, keepdims=True)
    return (x * jax.lax.rsqrt(var + EPS)) * w


def _rotate_half(x):
    half = x.shape[-1] // 2
    return jnp.concatenate([-x[..., half:], x[..., :half]], axis=-1)


def qwen_block_kernel(x_ref, cos_ref, sin_ref, mask_ref, w_ref, out_ref):
    x = x_ref[0]                       # (S, H)
    cos = cos_ref[0]                   # (S, D)
    sin = sin_ref[0]                   # (S, D)
    mask = mask_ref[0]                 # (S, S) additive mask for this batch element

    # static, sublane-aligned slices of the packed weight slab (single DMA operand)
    wqkv = w_ref[R_WQKV:R_WQKV + H, 0:QKVW]        # (H, QKVW)
    wgu = w_ref[R_WGU:R_WGU + H, 0:2 * I]          # (H, 2I)
    wo = w_ref[R_WO:R_WO + QW, 0:H]                # (QW, H)
    wd = w_ref[R_WD:R_WD + I, 0:H]                 # (I, H)
    bqkv = w_ref[R_BQKV:R_BQKV + 1, 0:QKVW]        # (1, QKVW)
    ln1 = w_ref[R_LN:R_LN + 1, 0:H]                # (1, H)
    ln2 = w_ref[R_LN:R_LN + 1, H:2 * H]            # (1, H)

    # --- self attention ---
    xn = _rmsnorm(x, ln1)
    qkv = jnp.dot(xn, wqkv, preferred_element_type=jnp.float32) + bqkv   # (S, QKVW)

    q = qkv[:, :QW].reshape(S, NH, D)              # (S, NH, D)
    k = qkv[:, QW:QW + KW].reshape(S, NKV, D)      # (S, NKV, D)
    v_flat = qkv[:, QW + KW:]                      # (S, KW)  (present_v, no RoPE)

    # RoPE in head-batched layout; cos/sin broadcast over heads (no wrapper tiling)
    cos_b = cos[:, None, :]
    sin_b = sin[:, None, :]

    def _rope(t):
        rot = jnp.concatenate([-t[..., D // 2:], t[..., :D // 2]], axis=-1)
        return t * cos_b + rot * sin_b

    q = _rope(q)
    k = _rope(k)
    k_flat = k.reshape(S, KW)                      # present_k (rotated), lane-dense

    qh = q.transpose(1, 0, 2)                      # (NH, S, D)
    kh = k.transpose(1, 0, 2)                      # (NKV, S, D)
    vh = v_flat.reshape(S, NKV, D).transpose(1, 0, 2)
    if GROUP > 1:                                  # GQA: replicate kv heads
        kh = jnp.repeat(kh, GROUP, axis=0)
        vh = jnp.repeat(vh, GROUP, axis=0)

    scale = 1.0 / (D ** 0.5)
    s = jnp.einsum('hqd,hkd->hqk', qh, kh,
                   preferred_element_type=jnp.float32) * scale + mask[None]
    s = s - jnp.max(s, axis=-1, keepdims=True)
    p = jnp.exp(s)
    # exact reciprocal for fp32 parity; pl.reciprocal(..., approx=True) at real sizes
    p = p * pl.reciprocal(jnp.sum(p, axis=-1, keepdims=True), approx=False)
    attn = jnp.einsum('hqk,hkd->hqd', p, vh, preferred_element_type=jnp.float32)
    attn_flat = attn.transpose(1, 0, 2).reshape(S, QW)

    # single full-width o_proj matmul + residual
    x2 = x + jnp.dot(attn_flat, wo, preferred_element_type=jnp.float32)

    # --- SwiGLU MLP with fused gate|up GEMM ---
    xn2 = _rmsnorm(x2, ln2)
    gu = jnp.dot(xn2, wgu, preferred_element_type=jnp.float32)   # (S, 2I) = (8, 128)
    gate = gu[:, :I]
    up = gu[:, I:]
    mlp = jnp.dot((gate * jax.nn.sigmoid(gate)) * up, wd,
                  preferred_element_type=jnp.float32)
    y = x2 + mlp

    # merged lane-dense (S, 128) output slab: [hidden_out | present_k | present_v | 0]
    pad = jnp.zeros((S, OUT_PAD), jnp.float32)
    out_ref[0] = jnp.concatenate([y, k_flat, v_flat, pad], axis=-1)


def _rope_tables(position_ids):
    inv_freq = 1.0 / (ROPE_BASE ** (jnp.arange(0, D, 2, dtype=jnp.float32) / D))
    freqs = position_ids.astype(jnp.float32)[..., None] * inv_freq
    emb = jnp.concatenate([freqs, freqs], axis=-1)          # (..., D)
    return jnp.cos(emb), jnp.sin(emb)


def _pack_weight_slab(params):
    """Pack every (tiny) parameter into one (SLAB_ROWS, 128) array -> one DMA."""
    (ln1, wq, bq, wk, bk, wv, bv, wo, ln2, wg, wu, wd) = params
    wqkv = jnp.concatenate([wq, wk, wv], axis=1)            # (H, QKVW)
    bqkv = jnp.concatenate([bq, bk, bv], axis=1)            # (1, QKVW)
    wgu = jnp.concatenate([wg, wu], axis=1)                 # (H, 2I)

    slab = jnp.zeros((SLAB_ROWS, SLAB_W), jnp.float32)
    slab = slab.at[R_WQKV:R_WQKV + H, 0:QKVW].set(wqkv)
    slab = slab.at[R_WGU:R_WGU + H, 0:2 * I].set(wgu)
    slab = slab.at[R_WO:R_WO + QW, 0:H].set(wo)
    slab = slab.at[R_WD:R_WD + I, 0:H].set(wd)
    slab = slab.at[R_BQKV:R_BQKV + 1, 0:QKVW].set(bqkv)
    slab = slab.at[R_LN:R_LN + 1, 0:H].set(ln1)
    slab = slab.at[R_LN:R_LN + 1, H:2 * H].set(ln2)
    return slab


@jax.jit
def qwen_block(hidden_states, position_ids, attention_mask, params):
    cos, sin = _rope_tables(position_ids)                   # (B, S, D)
    mask = attention_mask[:, 0]                             # (B, S, S)
    wslab = _pack_weight_slab(params)                       # wrapper glue

    slab = pl.pallas_call(
        qwen_block_kernel,
        out_shape=jax.ShapeDtypeStruct((B, S, OUT_W), jnp.float32),
        grid=(B,),
        in_specs=[
            pl.BlockSpec((1, S, H), lambda b: (b, 0, 0)),
            pl.BlockSpec((1, S, D), lambda b: (b, 0, 0)),
            pl.BlockSpec((1, S, D), lambda b: (b, 0, 0)),
            pl.BlockSpec((1, S, S), lambda b: (b, 0, 0)),
            pl.BlockSpec((SLAB_ROWS, SLAB_W), lambda b: (0, 0)),   # fetched once
        ],
        out_specs=pl.BlockSpec((1, S, OUT_W), lambda b: (b, 0, 0)),
        compiler_params=pltpu.CompilerParams(
            dimension_semantics=("parallel",)),
    )(hidden_states, cos, sin, mask, wslab)

    out = slab[:, :, :H]
    # HF past_key_value layout (B, num_kv_heads, S, head_dim): wrapper-side plumbing.
    pk = slab[:, :, H:H + KW].reshape(B, S, NKV, D).transpose(0, 2, 1, 3)
    pv = slab[:, :, H + KW:H + 2 * KW].reshape(B, S, NKV, D).transpose(0, 2, 1, 3)
    return out, pk, pv


def _reference(hidden_states, position_ids, attention_mask, params):
    (ln1, wq, bq, wk, bk, wv, bv, wo, ln2, wg, wu, wd) = params
    cos, sin = _rope_tables(position_ids)                   # (B, S, D)
    mask = attention_mask[:, 0]
    outs, pks, pvs = [], [], []
    for b in range(B):
        x = hidden_states[b]
        xn = _rmsnorm(x, ln1)
        q = xn @ wq + bq
        k = xn @ wk + bk
        v = xn @ wv + bv
        group = NH // NKV
        khs, vhs, ahs = [], [], []
        for h in range(NKV):
            kh = k[:, h * D:(h + 1) * D]
            khs.append(kh * cos[b] + _rotate_half(kh) * sin[b])
            vhs.append(v[:, h * D:(h + 1) * D])
        for h in range(NH):
            qh = q[:, h * D:(h + 1) * D]
            qh = qh * cos[b] + _rotate_half(qh) * sin[b]
            sc = qh @ khs[h // group].T / (D ** 0.5) + mask[b]
            p = jax.nn.softmax(sc, axis=-1)
            ahs.append(p @ vhs[h // group])
        x2 = x + jnp.concatenate(ahs, axis=-1) @ wo
        xn2 = _rmsnorm(x2, ln2)
        g = xn2 @ wg
        u = xn2 @ wu
        outs.append(x2 + ((g * jax.nn.sigmoid(g)) * u) @ wd)
        pks.append(jnp.stack(khs, 0))
        pvs.append(jnp.stack(vhs, 0))
    return jnp.stack(outs), jnp.stack(pks), jnp.stack(pvs)


def _init_params(key):
    keys = jax.random.split(key, 8)
    s = 0.02
    ln1 = jnp.ones((1, H), jnp.float32)
    ln2 = jnp.ones((1, H), jnp.float32)
    wq = s * jax.random.normal(keys[0], (H, NH * D), jnp.float32)
    bq = s * jax.random.normal(keys[1], (1, NH * D), jnp.float32)
    wk = s * jax.random.normal(keys[2], (H, NKV * D), jnp.float32)
    bk = s * jax.random.normal(keys[3], (1, NKV * D), jnp.float32)
    wv = s * jax.random.normal(keys[4], (H, NKV * D), jnp.float32)
    bv = s * jax.random.normal(keys[5], (1, NKV * D), jnp.float32)
    wo = s * jax.random.normal(keys[6], (NH * D, H), jnp.float32)
    k2 = jax.random.split(keys[7], 3)
    wg = s * jax.random.normal(k2[0], (H, I), jnp.float32)
    wu = s * jax.random.normal(k2[1], (H, I), jnp.float32)
    wd = s * jax.random.normal(k2[2], (I, H), jnp.float32)
    return (ln1, wq, bq, wk, bk, wv, bv, wo, ln2, wg, wu, wd)


if __name__ == "__main__":
    key = jax.random.PRNGKey(0)
    k_x, k_p = jax.random.split(key)
    hidden_states = jax.random.normal(k_x, (B, S, H), jnp.float32)
    position_ids = jnp.broadcast_to(jnp.arange(S, dtype=jnp.int32)[None, :], (B, S))
    # additive causal mask [B, 1, S, S]: 0 where allowed, large negative where masked
    causal = jnp.tril(jnp.ones((S, S), jnp.float32))
    attention_mask = jnp.where(causal[None, None] > 0, 0.0, NEG).astype(jnp.float32)
    params = _init_params(k_p)

    out, pk, pv = qwen_block(hidden_states, position_ids, attention_mask, params)
    jax.block_until_ready((out, pk, pv))

    ro, rk, rv = _reference(hidden_states, position_ids, attention_mask, params)
    assert jnp.allclose(out, ro, atol=1e-3, rtol=1e-3), float(jnp.max(jnp.abs(out - ro)))
    assert jnp.allclose(pk, rk, atol=1e-3, rtol=1e-3)
    assert jnp.allclose(pv, rv, atol=1e-3, rtol=1e-3)
    print("KERNEL_OK")
</pallas_src>

<mosaic_0001>
module attributes {stable_mosaic.version = 11 : i64} {
  func.func @qwen_block_kernel(%arg0: i32, %arg1: memref<1x8x32xf32, #tpu.memory_space<vmem>>, %arg2: memref<1x8x16xf32, #tpu.memory_space<vmem>>, %arg3: memref<1x8x16xf32, #tpu.memory_space<vmem>>, %arg4: memref<1x8x8xf32, #tpu.memory_space<vmem>>, %arg5: memref<176x128xf32, #tpu.memory_space<vmem>>, %arg6: memref<1x8x128xf32, #tpu.memory_space<vmem>>) attributes {dimension_semantics = [#tpu.dimension_semantics<parallel>], iteration_bounds = array<i64: 2>, scalar_prefetch = 0 : i64, scratch_operands = 0 : i64, tpu.core_type = #tpu.core_type<tc>, window_params = [{transform_indices = @transform_0, window_bounds = array<i64: 1, 8, 32>}, {transform_indices = @transform_1, window_bounds = array<i64: 1, 8, 16>}, {transform_indices = @transform_2, window_bounds = array<i64: 1, 8, 16>}, {transform_indices = @transform_3, window_bounds = array<i64: 1, 8, 8>}, {pipeline_mode = #tpu.pipeline_mode<synchronous>, transform_indices = @transform_4, window_bounds = array<i64: 176, 128>}, {transform_indices = @transform_5, window_bounds = array<i64: 1, 8, 128>}]} {
    %c0 = arith.constant 0 : index
    %c0_0 = arith.constant 0 : index
    %c0_1 = arith.constant 0 : index
    %0 = vector.load %arg1[%c0, %c0_0, %c0_1] : memref<1x8x32xf32, #tpu.memory_space<vmem>>, vector<1x8x32xf32>
    %1 = vector.shape_cast %0 : vector<1x8x32xf32> to vector<8x32xf32>
    %c0_2 = arith.constant 0 : index
    %c0_3 = arith.constant 0 : index
    %c0_4 = arith.constant 0 : index
    %2 = vector.load %arg2[%c0_2, %c0_3, %c0_4] : memref<1x8x16xf32, #tpu.memory_space<vmem>>, vector<1x8x16xf32>
    %3 = vector.shape_cast %2 : vector<1x8x16xf32> to vector<8x16xf32>
    %c0_5 = arith.constant 0 : index
    %c0_6 = arith.constant 0 : index
    %c0_7 = arith.constant 0 : index
    %4 = vector.load %arg3[%c0_5, %c0_6, %c0_7] : memref<1x8x16xf32, #tpu.memory_space<vmem>>, vector<1x8x16xf32>
    %5 = vector.shape_cast %4 : vector<1x8x16xf32> to vector<8x16xf32>
    %c0_8 = arith.constant 0 : index
    %c0_9 = arith.constant 0 : index
    %c0_10 = arith.constant 0 : index
    %6 = vector.load %arg4[%c0_8, %c0_9, %c0_10] : memref<1x8x8xf32, #tpu.memory_space<vmem>>, vector<1x8x8xf32>
    %7 = vector.shape_cast %6 : vector<1x8x8xf32> to vector<8x8xf32>
    %c0_11 = arith.constant 0 : index
    %c0_12 = arith.constant 0 : index
    %8 = vector.load %arg5[%c0_11, %c0_12] : memref<176x128xf32, #tpu.memory_space<vmem>>, vector<32x96xf32>
    %c32 = arith.constant 32 : index
    %c0_13 = arith.constant 0 : index
    %9 = vector.load %arg5[%c32, %c0_13] : memref<176x128xf32, #tpu.memory_space<vmem>>, vector<32x128xf32>
    %c64 = arith.constant 64 : index
    %c0_14 = arith.constant 0 : index
    %10 = vector.load %arg5[%c64, %c0_14] : memref<176x128xf32, #tpu.memory_space<vmem>>, vector<32x32xf32>
    %c96 = arith.constant 96 : index
    %c0_15 = arith.constant 0 : index
    %11 = vector.load %arg5[%c96, %c0_15] : memref<176x128xf32, #tpu.memory_space<vmem>>, vector<64x32xf32>
    %c160 = arith.constant 160 : index
    %c0_16 = arith.constant 0 : index
    %12 = vector.load %arg5[%c160, %c0_16] : memref<176x128xf32, #tpu.memory_space<vmem>>, vector<1x96xf32>
    %c168 = arith.constant 168 : index
    %c0_17 = arith.constant 0 : index
    %13 = vector.load %arg5[%c168, %c0_17] : memref<176x128xf32, #tpu.memory_space<vmem>>, vector<1x32xf32>
    %c168_18 = arith.constant 168 : index
    %c32_19 = arith.constant 32 : index
    %14 = vector.load %arg5[%c168_18, %c32_19] : memref<176x128xf32, #tpu.memory_space<vmem>>, vector<1x32xf32>
    %15 = arith.mulf %1, %1 : vector<8x32xf32>
    %cst = arith.constant dense<0.000000e+00> : vector<8xf32>
    %16 = vector.multi_reduction <add>, %15, %cst [1] : vector<8x32xf32> to vector<8xf32>
    %17 = vector.shape_cast %16 : vector<8xf32> to vector<8x1xf32>
    %cst_20 = arith.constant 3.200000e+01 : f32
    %18 = vector.broadcast %cst_20 : f32 to vector<8x1xf32>
    %19 = arith.divf %17, %18 : vector<8x1xf32>
    %cst_21 = arith.constant 9.99999997E-7 : f32
    %20 = vector.broadcast %cst_21 : f32 to vector<8x1xf32>
    %21 = arith.addf %19, %20 : vector<8x1xf32>
    %22 = math.rsqrt %21 : vector<8x1xf32>
    %23 = vector.broadcast %22 : vector<8x1xf32> to vector<8x32xf32>
    %24 = arith.mulf %1, %23 : vector<8x32xf32>
    %25 = vector.broadcast %13 : vector<1x32xf32> to vector<8x32xf32>
    %26 = arith.mulf %24, %25 : vector<8x32xf32>
    %cst_22 = arith.constant dense<0.000000e+00> : vector<8x96xf32>
    %27 = tpu.matmul %26, %8, %cst_22 {dimension_numbers = #tpu.dot_dimension_numbers<[1], [0], [0], [1], [0, 0, 1, 1], [], []>} : vector<8x32xf32>, vector<32x96xf32>, vector<8x96xf32> -> vector<8x96xf32>
    %28 = vector.broadcast %12 : vector<1x96xf32> to vector<8x96xf32>
    %29 = arith.addf %27, %28 : vector<8x96xf32>
    %30 = vector.extract_strided_slice %29 {offsets = [0, 0], sizes = [8, 32], strides = [1, 1]} : vector<8x96xf32> to vector<8x32xf32>
    %31 = vector.shape_cast %30 : vector<8x32xf32> to vector<8x2x16xf32>
    %32 = vector.extract_strided_slice %29 {offsets = [0, 32], sizes = [8, 32], strides = [1, 1]} : vector<8x96xf32> to vector<8x32xf32>
    %33 = vector.shape_cast %32 : vector<8x32xf32> to vector<8x2x16xf32>
    %34 = vector.extract_strided_slice %29 {offsets = [0, 64], sizes = [8, 32], strides = [1, 1]} : vector<8x96xf32> to vector<8x32xf32>
    %35 = vector.shape_cast %3 : vector<8x16xf32> to vector<8x1x16xf32>
    %36 = vector.shape_cast %5 : vector<8x16xf32> to vector<8x1x16xf32>
    %37 = vector.extract_strided_slice %31 {offsets = [0, 0, 8], sizes = [8, 2, 8], strides = [1, 1, 1]} : vector<8x2x16xf32> to vector<8x2x8xf32>
    %cst_23 = arith.constant 0.000000e+00 : f32
    %38 = vector.broadcast %cst_23 : f32 to vector<8x2x8xf32>
    %39 = arith.subf %38, %37 : vector<8x2x8xf32>
    %40 = vector.extract_strided_slice %31 {offsets = [0, 0, 0], sizes = [8, 2, 8], strides = [1, 1, 1]} : vector<8x2x16xf32> to vector<8x2x8xf32>
    %41 = tpu.concatenate %39, %40 in 2 : vector<8x2x8xf32>, vector<8x2x8xf32> -> vector<8x2x16xf32>
    %42 = vector.broadcast %35 : vector<8x1x16xf32> to vector<8x2x16xf32>
    %43 = arith.mulf %31, %42 : vector<8x2x16xf32>
    %44 = vector.broadcast %36 : vector<8x1x16xf32> to vector<8x2x16xf32>
    %45 = arith.mulf %41, %44 : vector<8x2x16xf32>
    %46 = arith.addf %43, %45 : vector<8x2x16xf32>
    %47 = vector.extract_strided_slice %33 {offsets = [0, 0, 8], sizes = [8, 2, 8], strides = [1, 1, 1]} : vector<8x2x16xf32> to vector<8x2x8xf32>
    %cst_24 = arith.constant 0.000000e+00 : f32
    %48 = vector.broadcast %cst_24 : f32 to vector<8x2x8xf32>
    %49 = arith.subf %48, %47 : vector<8x2x8xf32>
    %50 = vector.extract_strided_slice %33 {offsets = [0, 0, 0], sizes = [8, 2, 8], strides = [1, 1, 1]} : vector<8x2x16xf32> to vector<8x2x8xf32>
    %51 = tpu.concatenate %49, %50 in 2 : vector<8x2x8xf32>, vector<8x2x8xf32> -> vector<8x2x16xf32>
    %52 = vector.broadcast %35 : vector<8x1x16xf32> to vector<8x2x16xf32>
    %53 = arith.mulf %33, %52 : vector<8x2x16xf32>
    %54 = vector.broadcast %36 : vector<8x1x16xf32> to vector<8x2x16xf32>
    %55 = arith.mulf %51, %54 : vector<8x2x16xf32>
    %56 = arith.addf %53, %55 : vector<8x2x16xf32>
    %57 = vector.shape_cast %56 : vector<8x2x16xf32> to vector<8x32xf32>
    %58 = tpu.transpose %46, [1, 0, 2] : vector<8x2x16xf32> -> vector<2x8x16xf32>
    %59 = tpu.transpose %56, [1, 0, 2] : vector<8x2x16xf32> -> vector<2x8x16xf32>
    %60 = vector.shape_cast %34 : vector<8x32xf32> to vector<8x2x16xf32>
    %61 = tpu.transpose %60, [1, 0, 2] : vector<8x2x16xf32> -> vector<2x8x16xf32>
    "tpu.trace_start"() <{level = 10 : i32, message = "hqd,hkd->hqk"}> : () -> ()
    %cst_25 = arith.constant dense<0.000000e+00> : vector<2x8x8xf32>
    %62 = tpu.matmul %58, %59, %cst_25 {dimension_numbers = #tpu.dot_dimension_numbers<[2], [2], [1], [1], [0, 0, 0, 1, 1, 1], [0], [0]>} : vector<2x8x16xf32>, vector<2x8x16xf32>, vector<2x8x8xf32> -> vector<2x8x8xf32>
    "tpu.trace_stop"() : () -> ()
    %cst_26 = arith.constant 2.500000e-01 : f32
    %63 = vector.broadcast %cst_26 : f32 to vector<2x8x8xf32>
    %64 = arith.mulf %62, %63 : vector<2x8x8xf32>
    %65 = vector.shape_cast %7 : vector<8x8xf32> to vector<1x8x8xf32>
    %66 = vector.broadcast %65 : vector<1x8x8xf32> to vector<2x8x8xf32>
    %67 = arith.addf %64, %66 : vector<2x8x8xf32>
    %cst_27 = arith.constant dense<0xFF800000> : vector<2x8xf32>
    %68 = vector.multi_reduction <maximumf>, %67, %cst_27 [2] : vector<2x8x8xf32> to vector<2x8xf32>
    %69 = vector.shape_cast %68 : vector<2x8xf32> to vector<2x8x1xf32>
    %70 = vector.broadcast %69 : vector<2x8x1xf32> to vector<2x8x8xf32>
    %71 = arith.subf %67, %70 : vector<2x8x8xf32>
    %72 = math.exp %71 : vector<2x8x8xf32>
    %cst_28 = arith.constant dense<0.000000e+00> : vector<2x8xf32>
    %73 = vector.multi_reduction <add>, %72, %cst_28 [2] : vector<2x8x8xf32> to vector<2x8xf32>
    %74 = vector.shape_cast %73 : vector<2x8xf32> to vector<2x8x1xf32>
    %75 = tpu.reciprocal %74 : vector<2x8x1xf32> -> vector<2x8x1xf32>
    %76 = vector.broadcast %75 : vector<2x8x1xf32> to vector<2x8x8xf32>
    %77 = arith.mulf %72, %76 : vector<2x8x8xf32>
    "tpu.trace_start"() <{level = 10 : i32, message = "hqk,hkd->hqd"}> : () -> ()
    %cst_29 = arith.constant dense<0.000000e+00> : vector<2x8x16xf32>
    %78 = tpu.matmul %77, %61, %cst_29 {dimension_numbers = #tpu.dot_dimension_numbers<[2], [1], [1], [2], [0, 0, 0, 1, 1, 2], [0], [0]>} : vector<2x8x8xf32>, vector<2x8x16xf32>, vector<2x8x16xf32> -> vector<2x8x16xf32>
    "tpu.trace_stop"() : () -> ()
    %79 = tpu.transpose %78, [1, 0, 2] : vector<2x8x16xf32> -> vector<8x2x16xf32>
    %80 = vector.shape_cast %79 : vector<8x2x16xf32> to vector<8x32xf32>
    %cst_30 = arith.constant dense<0.000000e+00> : vector<8x32xf32>
    %81 = tpu.matmul %80, %10, %cst_30 {dimension_numbers = #tpu.dot_dimension_numbers<[1], [0], [0], [1], [0, 0, 1, 1], [], []>} : vector<8x32xf32>, vector<32x32xf32>, vector<8x32xf32> -> vector<8x32xf32>
    %82 = arith.addf %1, %81 : vector<8x32xf32>
    %83 = arith.mulf %82, %82 : vector<8x32xf32>
    %cst_31 = arith.constant dense<0.000000e+00> : vector<8xf32>
    %84 = vector.multi_reduction <add>, %83, %cst_31 [1] : vector<8x32xf32> to vector<8xf32>
    %85 = vector.shape_cast %84 : vector<8xf32> to vector<8x1xf32>
    %cst_32 = arith.constant 3.200000e+01 : f32
    %86 = vector.broadcast %cst_32 : f32 to vector<8x1xf32>
    %87 = arith.divf %85, %86 : vector<8x1xf32>
    %cst_33 = arith.constant 9.99999997E-7 : f32
    %88 = vector.broadcast %cst_33 : f32 to vector<8x1xf32>
    %89 = arith.addf %87, %88 : vector<8x1xf32>
    %90 = math.rsqrt %89 : vector<8x1xf32>
    %91 = vector.broadcast %90 : vector<8x1xf32> to vector<8x32xf32>
    %92 = arith.mulf %82, %91 : vector<8x32xf32>
    %93 = vector.broadcast %14 : vector<1x32xf32> to vector<8x32xf32>
    %94 = arith.mulf %92, %93 : vector<8x32xf32>
    %cst_34 = arith.constant dense<0.000000e+00> : vector<8x128xf32>
    %95 = tpu.matmul %94, %9, %cst_34 {dimension_numbers = #tpu.dot_dimension_numbers<[1], [0], [0], [1], [0, 0, 1, 1], [], []>} : vector<8x32xf32>, vector<32x128xf32>, vector<8x128xf32> -> vector<8x128xf32>
    %96 = vector.extract_strided_slice %95 {offsets = [0, 0], sizes = [8, 64], strides = [1, 1]} : vector<8x128xf32> to vector<8x64xf32>
    %97 = vector.extract_strided_slice %95 {offsets = [0, 64], sizes = [8, 64], strides = [1, 1]} : vector<8x128xf32> to vector<8x64xf32>
    %98 = arith.negf %96 : vector<8x64xf32>
    %99 = math.exp %98 : vector<8x64xf32>
    %cst_35 = arith.constant 1.000000e+00 : f32
    %100 = vector.broadcast %cst_35 : f32 to vector<8x64xf32>
    %101 = arith.addf %100, %99 : vector<8x64xf32>
    %102 = arith.divf %100, %101 : vector<8x64xf32>
    %103 = arith.mulf %96, %102 : vector<8x64xf32>
    %104 = arith.mulf %103, %97 : vector<8x64xf32>
    %cst_36 = arith.constant dense<0.000000e+00> : vector<8x32xf32>
    %105 = tpu.matmul %104, %11, %cst_36 {dimension_numbers = #tpu.dot_dimension_numbers<[1], [0], [0], [1], [0, 0, 1, 1], [], []>} : vector<8x64xf32>, vector<64x32xf32>, vector<8x32xf32> -> vector<8x32xf32>
    %106 = arith.addf %82, %105 : vector<8x32xf32>
    %cst_37 = arith.constant 0.000000e+00 : f32
    %107 = vector.broadcast %cst_37 : f32 to vector<8x32xf32>
    %108 = tpu.concatenate %106, %57, %34, %107 in 1 : vector<8x32xf32>, vector<8x32xf32>, vector<8x32xf32>, vector<8x32xf32> -> vector<8x128xf32>
    %c0_38 = arith.constant 0 : index
    %c0_39 = arith.constant 0 : index
    %c0_40 = arith.constant 0 : index
    %109 = vector.load %arg6[%c0_38, %c0_39, %c0_40] : memref<1x8x128xf32, #tpu.memory_space<vmem>>, vector<1x8x128xf32>
    %110 = vector.shape_cast %109 : vector<1x8x128xf32> to vector<8x128xf32>
    %111 = vector.shape_cast %108 : vector<8x128xf32> to vector<1x8x128xf32>
    tpu.vector_store %arg6[%c0_38, %c0_39, %c0_40], %111 {strides = array<i32>} : memref<1x8x128xf32, #tpu.memory_space<vmem>>, vector<1x8x128xf32>,
    return
  }
  func.func @transform_0(%arg0: i32) -> (i32, i32, i32) {
    %c0_i32 = arith.constant 0 : i32
    %c0_i32_0 = arith.constant 0 : i32
    %c0_i32_1 = arith.constant 0 : i32
    return %arg0, %c0_i32, %c0_i32_0 : i32, i32, i32
  }
  func.func @transform_1(%arg0: i32) -> (i32, i32, i32) {
    %c0_i32 = arith.constant 0 : i32
    %c0_i32_0 = arith.constant 0 : i32
    %c0_i32_1 = arith.constant 0 : i32
    return %arg0, %c0_i32, %c0_i32_0 : i32, i32, i32
  }
  func.func @transform_2(%arg0: i32) -> (i32, i32, i32) {
    %c0_i32 = arith.constant 0 : i32
    %c0_i32_0 = arith.constant 0 : i32
    %c0_i32_1 = arith.constant 0 : i32
    return %arg0, %c0_i32, %c0_i32_0 : i32, i32, i32
  }
  func.func @transform_3(%arg0: i32) -> (i32, i32, i32) {
    %c0_i32 = arith.constant 0 : i32
    %c0_i32_0 = arith.constant 0 : i32
    %c0_i32_1 = arith.constant 0 : i32
    return %arg0, %c0_i32, %c0_i32_0 : i32, i32, i32
  }
  func.func @transform_4(%arg0: i32) -> (i32, i32) {
    %c0_i32 = arith.constant 0 : i32
    %c0_i32_0 = arith.constant 0 : i32
    %c0_i32_1 = arith.constant 0 : i32
    return %c0_i32, %c0_i32_0 : i32, i32
  }
  func.func @transform_5(%arg0: i32) -> (i32, i32, i32) {
    %c0_i32 = arith.constant 0 : i32
    %c0_i32_0 = arith.constant 0 : i32
    %c0_i32_1 = arith.constant 0 : i32
    return %arg0, %c0_i32, %c0_i32_0 : i32, i32, i32
  }
}

</mosaic_0001>

<bundles_post_ra>
// kernel: qwen_block.1
= control target key start
LH: loop header
LB: loop body
LE: loop exit
PB: predicated region body
PF: predicated region fallthrough
CT: control target
= control target key end

     0   :  { %s2190_s18 = smov 0   ;;  %s2698_s0 = inlined_call_operand.vmem [shape: f32[2,8,32], index: 0, kind: input, shape index: {}]   ;;  %s2699_s1 = inlined_call_operand.vmem [shape: f32[2,8,16], index: 1, kind: input, shape index: {}]   ;;  %s2700_s2 = inlined_call_operand.vmem [shape: f32[2,8,16], index: 2, kind: input, shape index: {}]   ;;  %s2701_s3 = inlined_call_operand.vmem [shape: f32[1,8,8], index: 3, kind: input, shape index: {}]   ;;  %s2702_s4 = inlined_call_operand.vmem [shape: f32[176,128], index: 4, kind: input, shape index: {}]   ;;  %s2703_s5 = inlined_call_operand.vmem [shape: f32[2,8,128], index: 5, kind: output, shape index: {}]  }
   0x1 LB: > { %s2196_s19 = sadd.s32 4294967295, %s2145_s18   ;;  %p1941_p0 = scmp.ge.s32.totalorder %s2145_s18, 1  ;;  %s2145_s18 = sphi %s2190_s18, %s15_s18  }
   0x2   : > { %p213_p1 = scmp.lt.s32.totalorder %s2145_s18, 3 }
   0x4   : > { %p214_p2 = pnand %p1941_p0, %p213_p1 }
   0x5   : > { %p251_p3 = scmp.lt.s32.totalorder (!%p214_p2), %s2196_s19, 1  ;;  %vm298_vm0 = vcmask (!%p214_p2), 261120   ;;  %v275_v3 = vld [vmem:[%s2702_s4] sm:$0xff] (!%p214_p2)  ;;  %v276_v4 = vld [vmem:[%s2702_s4 + $0x8] sm:$0xff] (!%p214_p2)  ;;  %v277_v5 = vld [vmem:[%s2702_s4 + $0x10] sm:$0xff] (!%p214_p2)  ;;  %v2147_v6 = vmov (!%p214_p2), 0.0|0.0   ;;  %v397_v24 = vlaneseq (!%p214_p2) }
   0x6   : > { %217 = sbr.rel (%p214_p2) target bundleno = 2617 (0xa39), region = 40  ;;  %2070 = vmatprep.subr.bf16.mxu1 (!%p214_p2), %v2147_v6  ;;  %v2071_v7 = vpack.c.bf16 (!%p214_p2), %v276_v4, %v275_v3  ;;  %v278_v8 = vld [vmem:[%s2702_s4 + $0x18] sm:$0xff] (!%p214_p2)  ;;  %vm2148_vm1 = vmmov (!%p214_p2), 0   ;;  %v2149_v9 = vmov (!%p214_p2), 0.0   ;;  %v2236_v15 = vld [vmem:[%s2702_s4 + $0xa8] ss:$0 sm:$0xff] (!%p214_p2) }
   0x7   : > { %2006 = vmatprep.mubr.msk.f32.mxu1 (!%p214_p2), %vm2148_vm1, %v2149_v9  ;;  %2019 = vmatprep.subr.mxu0 (!%p214_p2), %v2149_v9  ;;  %v2074_v10 = vpack.c.bf16 (!%p214_p2), %v278_v8, %v277_v5  ;;  %v1948_v18 = vld [vmem:[%s2702_s4 + $0xa0] ss:$0 sm:$0xff] (!%p214_p2)  ;;  %s2150_s12 = smov (!%p214_p2), 96   ;;  %s2151_s13 = smov (!%p214_p2), 112   ;;  %v2152_v22 = vmov (!%p214_p2), 1983009808  }
   0x8   : > { %2021 = vmatprep.mubr.msk.f32.mxu0 (!%p214_p2), %vm2148_vm1, %v2149_v9  ;;  %2072 = vmatpush3.bf16.msra.mxu1 (!%p214_p2), %v2071_v7  ;;  %v395_v23 = vunpack.c.l.s4 (!%p214_p2), %v2152_v22  ;;  %v2251_v26 = vshrl.u32 (!%p214_p2), %v397_v24, 7  ;;  %v2153_v27 = vmov (!%p214_p2), 1934713408   ;;  %s2154_s14 = smov (!%p214_p2), 8   ;;  %s2155_s15 = smov (!%p214_p2), 120   ;;  %vm703_vm2 = vcmask (!%p214_p2), 64512  }
   0x9   : > { %2073 = vmatprep.subr.bf16.mxu1 (!%p214_p2), %v2147_v6  ;;  %v426_v28 = vunpack.c.l.s4 (!%p214_p2), %v2153_v27  ;;  %v2156_v59 = vmov (!%p214_p2), 1966171168   ;;  %vm974_vm3 = vcmask (!%p214_p2), 130048   ;;  %p263_p4 = scmp.lt.s32.totalorder (!%p214_p2), %s2196_s19, 0  ;;  %vm1764_vm4 = vcmask (!%p214_p2), 523264  }
   0xa   : > { %v396_v25 = vunpack.c.0.s8 (!%p214_p2), %v395_v23  ;;  %v534_v60 = vunpack.c.l.s4 (!%p214_p2), %v2156_v59  ;;  %vm1845_vm5 = vcmask (!%p214_p2), 785408  }
   0xb   : > { %v427_v30 = vunpack.c.0.s8 (!%p214_p2), %v426_v28 }
   0xc   : > { %2075 = vmatpush3.bf16.msra.mxu1 (!%p214_p2), %v2074_v10  ;;  %v2254_v29 = vsub.s32 (!%p214_p2), %v396_v25, %v2251_v26  ;;  %v535_v61 = vunpack.c.0.s8 (!%p214_p2), %v534_v60  ;;  %v2368_v25 = vsub.s32 (!%p214_p2), 0, %v2251_v26 }
   0xd   : > { %s252_s20 = scalar_select %p251_p3, %s2196_s19, 1  ;;  %2009 = vmatprep.subr.mxu1 %v2149_v9  ;;  %v2259_v32 = vsub.s32 %v427_v30, %v2251_v26 }
   0xe   : > { %v2338_v63 = vsub.s32 %v535_v61, %v2251_v26  ;;  %s2705_s19 = smov (!%p263_p4, %s2196_s19), 0 }
   0xf   : > { %s2202_s21 = sshll.u32 %s252_s20, 3  ;;  %s1945_s25 = sshll.u32 %s2705_s19, 3 }
  0x10   : > { %s254_s24 = scalar_lea.vmem %s2698_s0, %s2202_s21  ;;  %s258_s20 = scalar_lea.vmem %s2699_s1, %s2202_s21 }
  0x11   : > { %v2208_v0 = vld [vmem:[%s254_s24] sm:$0xff]  ;;  %s262_s24 = scalar_lea.vmem %s2700_s2, %s2202_s21  ;;  %s266_s28 = scalar_lea.vmem %s2701_s3, %s1945_s25 }
  0x12   : > { %v297_v1 = vmul.f32 %v2208_v0, %v2208_v0  ;;  %v2346_v8 = vld [vmem:[%s262_s24] sm:$0xff]  ;;  %s2157_s19 = smov 64   ;;  %s270_s17 = scalar_lea.vmem %s2703_s5, %s2202_s21 }
  0x14   : > { %v299_v2 = vsel %vm298_vm0, %v297_v1, 0.0  ;;  %v2340_v1 = vld [vmem:[%s258_s20] sm:$0xff] }
  0x15   : > { %300 = vadd.xlane.f32.xlu0 %v299_v2  ;;  %v539_v10 = vrot.slane %v2340_v1, %v2338_v63 }
  0xa2   : > { %v301_v11 = vpop.xlane.xlu0 %300 }
  0xa3   : > { %v303_v12 = vmul.f32 0.03125, %v301_v11 }
  0xa5   : > { %v304_v13 = vadd.f32 1e-06, %v303_v12 }
  0xa7   : > { %2123 = vrsqrt.f32 %v304_v13 }
  0xb1   : > { %v2124_v14 = vpop.eup %2123 }
  0xb2   : > { %v306_v16 = vmul.f32 %v2124_v14, %v2208_v0  ;;  %v589_v14 = vrot.slane %v2346_v8, %v2338_v63 }
  0xb4   : > { %v311_v17 = vmul.f32 %v2236_v15, %v306_v16  ;;  %v605_v28 = vrot.slane %v589_v14, %v2338_v63  ;;  %v597_v30 = vcombine.high %v589_v14, %v589_v14 }
  0xb6   : > { %2007 = vmatmul.mubr.msk.f32.vlgmr.msra.gmra.mrb[0].mxu1 %vm298_vm0, %v311_v17 }
  0xb7   : > { %2011 = vmatprep.mubr.msk.f32.mxu1 %vm2148_vm1, %v2149_v9 }
 0x189   : > { %v385_v19 = vpop.f32.mrb[0].mxu1 }
 0x18a   : > { %v2246_v20 = vadd.f32 %v1948_v18, %v385_v19  ;;  %v2008_v21 = vpop.f32.mrb[1].mxu1  ;;  %v555_v19 = vrot.slane %v539_v10, %v2338_v63 }
 0x18b   : > { %v547_v21 = vcombine.high %v539_v10, %v539_v10 }
 0x18c   : > { %459 = vrot.lane.b32.xlu1 %v2246_v20, %s2150_s12  ;;  %390 = vrot.lane.b32.xlu0 %v2246_v20, %s2151_s13  ;;  %v400_v33 = vrot.slane %v2246_v20, %v2254_v29  ;;  %v393_v41 = vcombine.high %v2246_v20, %v2149_v9  ;;  %s2158_s13 = smov 16  }
 0x18e   : > { %v407_v44 = vrot.slane %v393_v41, %v2254_v29  ;;  %v2384_v41 = vrot.slane %v555_v19, %v2368_v25 }
 0x1fe   : > { %v2256_v31 = vpop.permute.xlu0 %390  ;;  %v460_v62 = vpop.permute.xlu1 %459 }
 0x1ff   : > { %v415_v34 = vrot.slane %v2256_v31, %v2254_v29  ;;  %461 = vrot.lane.b32.xlu1 %v2256_v31, %s2150_s12  ;;  %v408_v38 = vcombine.high %v2256_v31, %v2149_v9  ;;  %v465_v3 = vcombine.high %v460_v62, %v2149_v9  ;;  %v472_v4 = vrot.slane %v460_v62, %v2254_v29 }
 0x201   : > { %v423_v35 = vcombine.low %v400_v33, %v415_v34  ;;  %v424_v36 = vcombine.high %v400_v33, %v415_v34  ;;  %v422_v42 = vrot.slane %v408_v38, %v2254_v29  ;;  %v479_v16 = vrot.slane %v465_v3, %v2254_v29 }
 0x202   : > { %v569_v34 = vrot.slane %v547_v21, %v2338_v63 }
 0x203   : > { %v2268_v37 = vrot.slane %v423_v35, %v2259_v32  ;;  %v2279_v40 = vrot.slane %v424_v36, %v2259_v32  ;;  %v439_v47 = vcombine.low %v407_v44, %v422_v42  ;;  %v440_v49 = vcombine.high %v407_v44, %v422_v42 }
 0x204   : > { %v577_v35 = vcombine.high %v555_v19, %v555_v19  ;;  %v2387_v44 = vrot.slane %v605_v28, %v2368_v25 }
 0x205   : > { %679 = vrot.lane.b32.xlu1 %v2268_v37, %s2154_s14  ;;  %v2276_v39 = vcombine.high %v2268_v37, %v2149_v9  ;;  %v2290_v43 = vcombine.high %v2279_v40, %v2149_v9  ;;  %v631_v45 = vsub.f32 0.0, %v2268_v37  ;;  %v633_v48 = vsub.f32 0.0, %v2279_v40 }
 0x206   : > { %v2303_v51 = vrot.slane %v439_v47, %v2259_v32  ;;  %v2307_v52 = vrot.slane %v440_v49, %v2259_v32  ;;  %v579_v49 = vcombine.high %v569_v34, %v569_v34  ;;  %v752_v59 = vmul.f32 %v2384_v41, %v2268_v37 }
 0x207   : > { %681 = vrot.lane.b32.xlu0 %v2276_v39, %s2154_s14  ;;  %v632_v46 = vsub.f32 0.0, %v2276_v39  ;;  %v634_v50 = vsub.f32 0.0, %v2290_v43 }
 0x208   : > { %v2313_v53 = vcombine.high %v2303_v51, %v2149_v9  ;;  %v635_v54 = vsub.f32 0.0, %v2303_v51  ;;  %v2322_v56 = vcombine.high %v2307_v52, %v2149_v9  ;;  %v637_v57 = vsub.f32 0.0, %v2307_v52 }
 0x209   : > { %683 = vrot.lane.b32.xlu1 %v2279_v40, %s2154_s14  ;;  %v2422_v10 = vrot.slane %v579_v49, %v2368_v25 }
 0x20a   : > { %v636_v55 = vsub.f32 0.0, %v2313_v53  ;;  %v638_v58 = vsub.f32 0.0, %v2322_v56 }
 0x20b   : > { %685 = vrot.lane.b32.xlu0 %v2290_v43, %s2154_s14 }
 0x20d   : > { %647 = vrot.lane.b32.xlu1 %v631_v45, %s2155_s15  ;;  %v619_v45 = vrot.slane %v597_v30, %v2338_v63 }
 0x20f   : > { %649 = vrot.lane.b32.xlu0 %v632_v46, %s2155_s15  ;;  %v627_v46 = vcombine.high %v605_v28, %v605_v28  ;;  %v2409_v61 = vrot.slane %v619_v45, %v2368_v25  ;;  %v755_v28 = vmul.f32 %v2422_v10, %v2290_v43 }
 0x211   : > { %651 = vrot.lane.b32.xlu1 %v633_v48, %s2155_s15 }
 0x213   : > { %653 = vrot.lane.b32.xlu0 %v634_v50, %s2155_s15  ;;  %v629_v50 = vcombine.high %v619_v45, %v619_v45 }
 0x215   : > { %687 = vrot.lane.b32.xlu1 %v2303_v51, %s2154_s14 }
 0x217   : > { %689 = vrot.lane.b32.xlu0 %v2313_v53, %s2154_s14 }
 0x219   : > { %655 = vrot.lane.b32.xlu1 %v635_v54, %s2155_s15 }
 0x21b   : > { %657 = vrot.lane.b32.xlu0 %v636_v55, %s2155_s15 }
 0x21d   : > { %659 = vrot.lane.b32.xlu1 %v637_v57, %s2155_s15 }
 0x21f   : > { %661 = vrot.lane.b32.xlu0 %v638_v58, %s2155_s15  ;;  %v2403_v58 = vrot.slane %v577_v35, %v2368_v25 }
 0x271   : > { %v462_v2 = vpop.permute.xlu1 %461 }
 0x272   : > { %v480_v5 = vcombine.high %v462_v2, %v2149_v9  ;;  %v487_v7 = vrot.slane %v462_v2, %v2254_v29  ;;  %v2412_v2 = vrot.slane %v627_v46, %v2368_v25 }
 0x274   : > { %v494_v11 = vrot.slane %v480_v5, %v2254_v29  ;;  %v495_v12 = vcombine.low %v472_v4, %v487_v7  ;;  %v496_v13 = vcombine.high %v472_v4, %v487_v7  ;;  %v2419_v7 = vrot.slane %v569_v34, %v2368_v25 }
 0x276   : > { %v2355_v17 = vrot.slane %v495_v12, %v2259_v32  ;;  %v2359_v22 = vrot.slane %v496_v13, %v2259_v32  ;;  %v511_v23 = vcombine.low %v479_v16, %v494_v11  ;;  %v512_v36 = vcombine.high %v479_v16, %v494_v11 }
 0x277   : > { %v680_v18 = vpop.permute.xlu1 %679  ;;  %v2425_v11 = vrot.slane %v629_v50, %v2368_v25  ;;  %v754_v16 = vmul.f32 %v2403_v58, %v2279_v40 }
 0x278   : > { %864 = vrot.lane.b32.xlu1 %v2355_v17, %s2154_s14  ;;  %v2365_v24 = vcombine.high %v2355_v17, %v2149_v9  ;;  %v2375_v38 = vrot.slane %v511_v23, %v2259_v32  ;;  %v2381_v26 = vcombine.high %v2359_v22, %v2149_v9  ;;  %v816_v47 = vsub.f32 0.0, %v2355_v17 }
 0x279   : > { %v682_v27 = vpop.permute.xlu0 %681  ;;  %v2394_v54 = vrot.slane %v512_v36, %v2259_v32  ;;  %v818_v4 = vsub.f32 0.0, %v2359_v22  ;;  %v753_v23 = vmul.f32 %v2419_v7, %v2276_v39 }
 0x27a   : > { %866 = vrot.lane.b32.xlu0 %v2365_v24, %s2154_s14  ;;  %v2400_v57 = vcombine.high %v2375_v38, %v2149_v9  ;;  %v817_v45 = vsub.f32 0.0, %v2365_v24 }
 0x27b   : > { %v684_v33 = vpop.permute.xlu1 %683  ;;  %v2431_v13 = vcombine.high %v2394_v54, %v2149_v9  ;;  %v822_v49 = vsub.f32 0.0, %v2394_v54 }
 0x27c   : > { %868 = vrot.lane.b32.xlu1 %v2359_v22, %s2154_s14  ;;  %v821_v40 = vsub.f32 0.0, %v2400_v57 }
 0x27d   : > { %v686_v42 = vpop.permute.xlu0 %685  ;;  %v823_v39 = vsub.f32 0.0, %v2431_v13 }
 0x27e   : > { %870 = vrot.lane.b32.xlu0 %v2381_v26, %s2154_s14 }
 0x27f   : > { %v648_v48 = vpop.permute.xlu1 %647 }
 0x280   : > { %v704_v55 = vsel %vm703_vm2, %v648_v48, %v680_v18  ;;  %832 = vrot.lane.b32.xlu1 %v816_v47, %s2155_s15  ;;  %v819_v47 = vsub.f32 0.0, %v2381_v26  ;;  %v820_v48 = vsub.f32 0.0, %v2375_v38 }
 0x281   : > { %v800_v60 = vmul.f32 %v2387_v44, %v704_v55  ;;  %v650_v62 = vpop.permute.xlu0 %649 }
 0x282   : > { %v705_v3 = vsel %vm703_vm2, %v650_v62, %v682_v27  ;;  %874 = vrot.lane.b32.xlu0 %v2400_v57, %s2154_s14 }
 0x283   : > { %v808_v5 = vadd.f32 %v800_v60, %v752_v59  ;;  %v652_v37 = vpop.permute.xlu1 %651  ;;  %v801_v14 = vmul.f32 %v2409_v61, %v705_v3 }
 0x284   : > { %v706_v12 = vsel %vm703_vm2, %v652_v37, %v684_v33  ;;  %836 = vrot.lane.b32.xlu1 %v818_v4, %s2155_s15  ;;  %v582_v37 = vcombine.high %v2346_v8, %v2346_v8 }
 0x285   : > { %v802_v18 = vmul.f32 %v2412_v2, %v706_v12  ;;  %v654_v19 = vpop.permute.xlu0 %653  ;;  %v809_v33 = vadd.f32 %v801_v14, %v753_v23 }
 0x286   : > { %v707_v21 = vsel %vm703_vm2, %v654_v19, %v686_v42  ;;  %878 = vrot.lane.b32.xlu0 %v2431_v13, %s2154_s14 }
 0x287   : > { %v810_v27 = vadd.f32 %v802_v18, %v754_v16  ;;  %v803_v30 = vmul.f32 %v2425_v11, %v707_v21  ;;  %v2473_v50 = vpop.permute.xlu1 %687  ;;  %v596_v18 = vrot.slane %v582_v37, %v2338_v63 }
 0x288   : > { %872 = vrot.lane.b32.xlu1 %v2375_v38, %s2154_s14 }
 0x289   : > { %v976_v34 = vcombine.low %v808_v5, %v810_v27  ;;  %v811_v35 = vadd.f32 %v803_v30, %v755_v28  ;;  %v2475_v55 = vpop.permute.xlu0 %689  ;;  %v532_v5 = vcombine.high %v2340_v1, %v2340_v1  ;;  %v598_v28 = vcombine.high %v596_v18, %v596_v18 }
 0x28a   : > { %842 = vrot.lane.b32.xlu0 %v821_v40, %s2155_s15 }
 0x28b   : > { %v984_v36 = vcombine.low %v809_v33, %v811_v35  ;;  %v2453_v43 = vrot.slane %v976_v34, %v2254_v29  ;;  %v2477_v59 = vpop.permute.xlu1 %655  ;;  %v546_v16 = vrot.slane %v532_v5, %v2338_v63  ;;  %v626_v34 = vrot.slane %v598_v28, %v2338_v63 }
 0x28c   : > { %876 = vrot.lane.b32.xlu1 %v2394_v54, %s2154_s14  ;;  %v896_v35 = vmul.f32 %v2384_v41, %v2355_v17 }
 0x28d   : > { %v2456_v42 = vrot.slane %v984_v36, %v2254_v29  ;;  %v2479_v60 = vpop.permute.xlu0 %657  ;;  %v548_v23 = vcombine.high %v546_v16, %v546_v16  ;;  %v898_v36 = vmul.f32 %v2403_v58, %v2359_v22 }
 0x28e   : > { %846 = vrot.lane.b32.xlu0 %v823_v39, %s2155_s15 }
 0x28f   : > { %v1008_v46 = vcombine.low %v2453_v43, %v2456_v42  ;;  %v2481_v62 = vpop.permute.xlu1 %659  ;;  %v576_v1 = vrot.slane %v548_v23, %v2338_v63  ;;  %v274_v42 = vld [vmem:[%s266_s28] sm:$0xff] }
 0x290   : > { %834 = vrot.lane.b32.xlu1 %v817_v45, %s2155_s15 }
 0x291   : > { %v662_v3 = vpop.permute.xlu0 %661  ;;  %v580_v37 = vcombine.high %v576_v1, %v576_v1  ;;  %v735_v41 = vrot.slane %v576_v1, %v2368_v25  ;;  %v612_v1 = vrot.slane %v596_v18, %v2338_v63 }
 0x292   : > { %693 = vrot.lane.b32.xlu0 %v2322_v56, %s2154_s14 }
 0x293   : > { %v743_v58 = vrot.slane %v580_v37, %v2368_v25  ;;  %v901_v28 = vmul.f32 %v735_v41, %v2400_v57  ;;  %v897_v57 = vmul.f32 %v2419_v7, %v2365_v24 }
 0x294   : > { %838 = vrot.lane.b32.xlu1 %v819_v47, %s2155_s15 }
 0x298   : > { %840 = vrot.lane.b32.xlu1 %v820_v48, %s2155_s15 }
 0x29c   : > { %844 = vrot.lane.b32.xlu1 %v822_v49, %s2155_s15 }
 0x2a0   : > { %691 = vrot.lane.b32.xlu1 %v2307_v52, %s2154_s14 }
 0x2ea   : > { %v865_v4 = vpop.permute.xlu1 %864 }
 0x2ec   : > { %v867_v12 = vpop.permute.xlu0 %866 }
 0x2ee   : > { %v869_v14 = vpop.permute.xlu1 %868 }
 0x2f0   : > { %v871_v19 = vpop.permute.xlu0 %870 }
 0x2f2   : > { %v833_v21 = vpop.permute.xlu1 %832 }
 0x2f3   : > { %v888_v27 = vsel %vm703_vm2, %v833_v21, %v865_v4  ;;  %v783_v21 = vrot.slane %v626_v34, %v2368_v25 }
 0x2f4   : > { %v875_v30 = vpop.permute.xlu0 %874  ;;  %v904_v40 = vmul.f32 %v888_v27, %v2387_v44  ;;  %v630_v44 = vcombine.high %v626_v34, %v626_v34 }
 0x2f6   : > { %v837_v33 = vpop.permute.xlu1 %836  ;;  %v912_v47 = vadd.f32 %v904_v40, %v896_v35  ;;  %v791_v17 = vrot.slane %v630_v44, %v2368_v25  ;;  %v903_v40 = vmul.f32 %v743_v58, %v2431_v13  ;;  %v899_v44 = vmul.f32 %v2422_v10, %v2381_v26 }
 0x2f7   : > { %v890_v8 = vsel %vm703_vm2, %v837_v33, %v869_v14  ;;  %v708_v26 = vsel %vm703_vm2, %v2477_v59, %v2473_v50  ;;  %v709_v10 = vsel %vm703_vm2, %v2479_v60, %v2475_v55 }
 0x2f8   : > { %v906_v39 = vmul.f32 %v890_v8, %v2412_v2  ;;  %v879_v45 = vpop.permute.xlu0 %878  ;;  %v805_v50 = vmul.f32 %v783_v21, %v709_v10 }
 0x2fa   : > { %v914_v48 = vadd.f32 %v906_v39, %v898_v36  ;;  %v873_v49 = vpop.permute.xlu1 %872  ;;  %v562_v36 = vrot.slane %v546_v16, %v2338_v63 }
 0x2fc   : > { %v920_v4 = vcombine.low %v912_v47, %v914_v48  ;;  %v843_v5 = vpop.permute.xlu0 %842  ;;  %v578_v37 = vcombine.high %v562_v36, %v562_v36  ;;  %v731_v7 = vrot.slane %v562_v36, %v2368_v25 }
 0x2fd   : > { %v893_v14 = vsel %vm703_vm2, %v843_v5, %v875_v30  ;;  %v628_v5 = vcombine.high %v612_v1, %v612_v1 }
 0x2fe   : > { %v877_v23 = vpop.permute.xlu1 %876  ;;  %v909_v22 = vmul.f32 %v893_v14, %v783_v21  ;;  %v756_v36 = vmul.f32 %v731_v7, %v2303_v51 }
 0x2ff   : > { %v787_v24 = vrot.slane %v628_v5, %v2368_v25 }
 0x300   : > { %v847_v2 = vpop.permute.xlu0 %846  ;;  %v917_v34 = vadd.f32 %v909_v22, %v901_v28 }
 0x301   : > { %v895_v27 = vsel %vm703_vm2, %v847_v2, %v879_v45 }
 0x302   : > { %v911_v33 = vmul.f32 %v895_v27, %v791_v17  ;;  %v835_v8 = vpop.permute.xlu1 %834 }
 0x303   : > { %v889_v30 = vsel %vm703_vm2, %v835_v8, %v867_v12 }
 0x304   : > { %v919_v35 = vadd.f32 %v911_v33, %v903_v40  ;;  %v905_v47 = vmul.f32 %v889_v30, %v2409_v61  ;;  %v694_v13 = vpop.permute.xlu0 %693  ;;  %v759_v40 = vmul.f32 %v743_v58, %v2322_v56  ;;  %v900_v33 = vmul.f32 %v731_v7, %v2375_v38 }
 0x305   : > { %v711_v18 = vsel %vm703_vm2, %v662_v3, %v694_v13  ;;  %v927_v3 = vrot.slane %v920_v4, %v2254_v29 }
 0x306   : > { %v944_v39 = vcombine.low %v917_v34, %v919_v35  ;;  %v839_v48 = vpop.permute.xlu1 %838  ;;  %v913_v16 = vadd.f32 %v905_v47, %v897_v57 }
 0x307   : > { %v891_v45 = vsel %vm703_vm2, %v839_v48, %v871_v19  ;;  %v779_v19 = vrot.slane %v612_v1, %v2368_v25 }
 0x308   : > { %v907_v12 = vmul.f32 %v891_v45, %v2425_v11  ;;  %v739_v11 = vrot.slane %v578_v37, %v2368_v25  ;;  %v757_v25 = vmul.f32 %v735_v41, %v2313_v53 }
 0x309   : > { %v804_v60 = vmul.f32 %v779_v19, %v708_v26 }
 0x30a   : > { %v915_v14 = vadd.f32 %v907_v12, %v899_v44  ;;  %v841_v63 = vpop.permute.xlu1 %840  ;;  %v902_v30 = vmul.f32 %v739_v11, %v2394_v54  ;;  %v813_v38 = vadd.f32 %v805_v50, %v757_v25  ;;  %v758_v21 = vmul.f32 %v739_v11, %v2307_v52 }
 0x30b   : > { %v892_v61 = vsel %vm703_vm2, %v841_v63, %v873_v49  ;;  %v807_v49 = vmul.f32 %v791_v17, %v711_v18  ;;  %v812_v1 = vadd.f32 %v804_v60, %v756_v36  ;;  %v951_v54 = vrot.slane %v944_v39, %v2254_v29 }
 0x30c   : > { %v928_v22 = vcombine.low %v913_v16, %v915_v14  ;;  %v908_v27 = vmul.f32 %v892_v61, %v779_v19  ;;  %v1015_v12 = vrot.slane %v1008_v46, %v2259_v32 }
 0x30d   : > { %v815_v4 = vadd.f32 %v807_v49, %v759_v40 }
 0x30e   : > { %v935_v2 = vrot.slane %v928_v22, %v2254_v29  ;;  %v845_v28 = vpop.permute.xlu1 %844  ;;  %v916_v17 = vadd.f32 %v908_v27, %v900_v33 }
 0x30f   : > { %v894_v8 = vsel %vm703_vm2, %v845_v28, %v877_v23  ;;  %v1000_v47 = vcombine.low %v813_v38, %v815_v4 }
 0x310   : > { %v952_v59 = vcombine.low %v927_v3, %v935_v2  ;;  %v910_v55 = vmul.f32 %v894_v8, %v787_v24 }
 0x311   : > { %v1007_v57 = vrot.slane %v1000_v47, %v2254_v29 }
 0x312   : > { %v918_v34 = vadd.f32 %v910_v55, %v902_v30  ;;  %v692_v35 = vpop.permute.xlu1 %691  ;;  %v959_v51 = vrot.slane %v952_v59, %v2259_v32 }
 0x313   : > { %v710_v56 = vsel %vm703_vm2, %v2481_v62, %v692_v35 }
 0x314   : > { %v936_v58 = vcombine.low %v916_v17, %v918_v34  ;;  %v806_v23 = vmul.f32 %v787_v24, %v710_v56 }
 0x316   : > { %v943_v53 = vrot.slane %v936_v58, %v2254_v29  ;;  %v814_v41 = vadd.f32 %v806_v23, %v758_v21 }
 0x318   : > { %v960_v48 = vcombine.low %v943_v53, %v951_v54  ;;  %v992_v45 = vcombine.low %v812_v1, %v814_v41 }
 0x31a   : > { %v967_v62 = vrot.slane %v960_v48, %v2259_v32  ;;  %v999_v13 = vrot.slane %v992_v45, %v2254_v29 }
 0x31c   : > { %v1016_v52 = vcombine.low %v999_v13, %v1007_v57  ;;  %v2546_v44 = vcombine.low %v959_v51, %v967_v62  ;;  %v2548_v39 = vcombine.high %v959_v51, %v967_v62 }
 0x31e   : > { %v1023_v5 = vrot.slane %v1016_v52, %v2259_v32  ;;  %2010 = vmatpush3.xpose.msk.msra.mxu1 %vm974_vm3, %v2546_v44 }
 0x31f   : > { %2014 = vmatprep.subr.mxu1 %v2149_v9 }
 0x320   : > { %v1024_v37 = vcombine.low %v1015_v12, %v1023_v5  ;;  %v1025_v16 = vcombine.high %v1015_v12, %v1023_v5 }
 0x322   : > { %2012 = vmatmul.mubr.msk.f32.vlgmr.msra.gmra.mrb[2].mxu1 %vm974_vm3, %v1024_v37 }
 0x323   : > { %2015 = vmatpush3.xpose.msk.msra.mxu1 %vm974_vm3, %v2548_v39  ;;  %2016 = vmatprep.mubr.msk.f32.mxu1 %vm2148_vm1, %v2149_v9 }
 0x324   : > { %2024 = vmatprep.subr.mxu1 %v2149_v9 }
 0x326   : > { %2017 = vmatmul.mubr.msk.f32.vlgmr.msra.gmra.mrb[4].mxu1 %vm974_vm3, %v1025_v16 }
 0x327   : > { %2026 = vmatprep.mubr.msk.f32.mxu1 %vm2148_vm1, %v2149_v9 }
 0x3f5   : > { %v1220_v43 = vpop.f32.mrb[2].mxu1 }
 0x3f6   : > { %v1299_v46 = vmul.f32 0.25, %v1220_v43  ;;  %v2013_v14 = vpop.f32.mrb[3].mxu1 }
 0x3f7   : > { %v284_v14 = vld [vmem:[%s2702_s4 + $0x48] sm:$0xff] }
 0x3f8   : > { %v1301_v63 = vadd.f32 %v1299_v46, %v274_v42  ;;  %v283_v46 = vld [vmem:[%s2702_s4 + $0x40] sm:$0xff] }
 0x3f9   : > { %v1295_v18 = vpop.f32.mrb[4].mxu1 }
 0x3fa   : > { %v1300_v61 = vmul.f32 0.25, %v1295_v18  ;;  %v2018_v19 = vpop.f32.mrb[5].mxu1  ;;  %v1303_v22 = vsel %vm703_vm2, %v1301_v63, -inf  ;;  %v2077_v18 = vpack.c.bf16 %v284_v14, %v283_v46  ;;  %v289_v46 = vld [vmem:[%s2702_s4 + $0x70] sm:$0xff] }
 0x3fb   : > { %1304 = vmax.xlane.f32.xlu1 %v1303_v22 }
 0x3fc   : > { %v1302_v24 = vadd.f32 %v1300_v61, %v274_v42  ;;  %v286_v61 = vld [vmem:[%s2702_s4 + $0x58] sm:$0xff] }
 0x3fe   : > { %v1306_v7 = vsel %vm703_vm2, %v1302_v24, -inf }
 0x3ff   : > { %1307 = vmax.xlane.f32.xlu0 %v1306_v7 }
 0x488   : > { %v1305_v26 = vpop.xlane.xlu1 %1304 }
 0x489   : > { %v1309_v10 = vsub.f32 %v1301_v63, %v1305_v26  ;;  %v285_v63 = vld [vmem:[%s2702_s4 + $0x50] sm:$0xff] }
 0x48a   : > { %v2080_v19 = vpack.c.bf16 %v286_v61, %v285_v63  ;;  %v290_v63 = vld [vmem:[%s2702_s4 + $0x78] sm:$0xff]  ;;  %v291_v61 = vld [vmem:[%s2702_s4 + $0x80] sm:$0xff] }
 0x48b   : > { %v1311_v11 = vmul.f32 1.442695, %v1309_v10 }
 0x48c   : > { %v1308_v3 = vpop.xlane.xlu0 %1307 }
 0x48d   : > { %2125 = vpow2.f32 %v1311_v11  ;;  %v1310_v49 = vsub.f32 %v1302_v24, %v1308_v3 }
 0x48f   : > { %v1313_v2 = vmul.f32 1.442695, %v1310_v49 }
 0x491   : > { %2127 = vpow2.f32 %v1313_v2 }
 0x497   : > { %v2126_v27 = vpop.eup %2125 }
 0x498   : > { %v1315_v28 = vsel %vm703_vm2, %v2126_v27, 0.0 }
 0x499   : > { %1316 = vadd.xlane.f32.xlu0 %v1315_v28 }
 0x49b   : > { %v2128_v40 = vpop.eup %2127 }
 0x49c   : > { %v1318_v33 = vsel %vm703_vm2, %v2128_v40, 0.0 }
 0x49d   : > { %1319 = vadd.xlane.f32.xlu1 %v1318_v33 }
 0x4ae   : > { %1028 = vrot.lane.b32.xlu1 %v2256_v31, %s2157_s19 }
 0x4af   : > { %1026 = vrot.lane.b32.xlu0 %v2246_v20, %s2157_s19 }
 0x526   : > { %v1317_v8 = vpop.xlane.xlu0 %1316 }
 0x527   : > { %2129 = vrcp.f32 %v1317_v8 }
 0x52a   : > { %v1320_v50 = vpop.xlane.xlu1 %1319  ;;  %v1027_v59 = vpop.permute.xlu0 %1026 }
 0x52b   : > { %v1032_v30 = vcombine.high %v1027_v59, %v2149_v9  ;;  %v1039_v60 = vrot.slane %v1027_v59, %v2254_v29  ;;  %2131 = vrcp.f32 %v1320_v50 }
 0x52d   : > { %v1046_v17 = vrot.slane %v1032_v30, %v2254_v29 }
 0x52e   : > { %v1029_v55 = vpop.permute.xlu1 %1028 }
 0x52f   : > { %v1047_v25 = vcombine.high %v1029_v55, %v2149_v9  ;;  %v1054_v4 = vrot.slane %v1029_v55, %v2254_v29 }
 0x531   : > { %v1061_v31 = vrot.slane %v1047_v25, %v2254_v29  ;;  %v1062_v34 = vcombine.low %v1039_v60, %v1054_v4  ;;  %v1063_v35 = vcombine.high %v1039_v60, %v1054_v4  ;;  %v2130_v62 = vpop.eup %2129 }
 0x532   : > { %v1323_v42 = vmul.f32 %v2130_v62, %v2126_v27 }
 0x533   : > { %v1070_v36 = vrot.slane %v1062_v34, %v2259_v32  ;;  %v1077_v56 = vrot.slane %v1063_v35, %v2259_v32  ;;  %v1078_v38 = vcombine.low %v1046_v17, %v1061_v31  ;;  %v1079_v58 = vcombine.high %v1046_v17, %v1061_v31 }
 0x535   : > { %v1086_v21 = vrot.slane %v1078_v38, %v2259_v32  ;;  %v1093_v23 = vrot.slane %v1079_v58, %v2259_v32  ;;  %v1098_v1 = vcombine.low %v1070_v36, %v1077_v56  ;;  %v1950_v54 = vcombine.high %v1070_v36, %v1077_v56  ;;  %v2132_v52 = vpop.eup %2131 }
 0x536   : > { %v1324_v43 = vmul.f32 %v2132_v52, %v2128_v40 }
 0x537   : > { %v1105_v47 = vrot.slane %v1098_v1, %v2254_v29  ;;  %v1113_v53 = vrot.slane %v1950_v54, %v2254_v29  ;;  %v1114_v41 = vcombine.low %v1086_v21, %v1093_v23  ;;  %v1951_v48 = vcombine.high %v1086_v21, %v1093_v23 }
 0x539   : > { %v1121_v45 = vrot.slane %v1114_v41, %v2254_v29  ;;  %v1129_v57 = vrot.slane %v1951_v48, %v2254_v29  ;;  %v1130_v51 = vcombine.low %v1105_v47, %v1113_v53 }
 0x53b   : > { %v1138_v13 = vcombine.low %v1121_v45, %v1129_v57  ;;  %v1137_v12 = vrot.slane %v1130_v51, %v2259_v32  ;;  %v280_v45 = vld [vmem:[%s2702_s4 + $0x28] sm:$0xff] }
 0x53d   : > { %v1145_v5 = vrot.slane %v1138_v13, %v2259_v32 }
 0x53f   : > { %v1146_v37 = vcombine.low %v1137_v12, %v1145_v5  ;;  %v1147_v16 = vcombine.high %v1137_v12, %v1145_v5 }
 0x541   : > { %2020 = vmatpush3.msra.mxu0 %v1146_v37  ;;  %2025 = vmatpush3.msra.mxu1 %v1147_v16 }
 0x542   : > { %2022 = vmatmul.mubr.msk.f32.vlgmr.msra.gmra.mrb[0].mxu0 %vm703_vm2, %v1323_v42  ;;  %2027 = vmatmul.mubr.msk.f32.vlgmr.msra.gmra.mrb[6].mxu1 %vm703_vm2, %v1324_v43  ;;  %v287_v43 = vld [vmem:[%s2702_s4 + $0x60] sm:$0xff]  ;;  %v288_v42 = vld [vmem:[%s2702_s4 + $0x68] sm:$0xff] }
 0x543   : > { %2076 = vmatprep.subr.bf16.mxu0 %v2147_v6  ;;  %2037 = vmatprep.mubr.msk.f32.mxu0 %vm2148_vm1, %v2149_v9  ;;  %v2089_v14 = vpack.c.bf16 %v288_v42, %v287_v43 }
 0x544   : > { %2082 = vmatprep.subr.bf16.mxu1 %v2147_v6  ;;  %2048 = vmatprep.mubr.msk.f32.mxu1 %vm2148_vm1, %v2149_v9 }
 0x545   : > { %2078 = vmatpush3.bf16.msra.mxu0 %v2077_v18  ;;  %v2092_v18 = vpack.c.bf16 %v290_v63, %v289_v46 }
 0x546   : > { %2079 = vmatprep.subr.bf16.mxu0 %v2147_v6 }
 0x549   : > { %2081 = vmatpush3.bf16.msra.mxu0 %v2080_v19  ;;  %v292_v19 = vld [vmem:[%s2702_s4 + $0x88] sm:$0xff] }
 0x54a   : > { %2088 = vmatprep.subr.bf16.mxu0 %v2147_v6 }
 0x615   : > { %v1394_v22 = vpop.f32.mrb[0].mxu0  ;;  %v1467_v24 = vpop.f32.mrb[6].mxu1 }
 0x616   : > { %v1471_v7 = vcombine.high %v1394_v22, %v2149_v9  ;;  %v1478_v26 = vrot.slane %v1394_v22, %v2254_v29  ;;  %v1486_v10 = vcombine.high %v1467_v24, %v2149_v9  ;;  %v1493_v11 = vrot.slane %v1467_v24, %v2254_v29  ;;  %v2023_v3 = vpop.f32.mrb[1].mxu0  ;;  %v2028_v49 = vpop.f32.mrb[7].mxu1  ;;  %v293_v24 = vld [vmem:[%s2702_s4 + $0x90] sm:$0xff] }
 0x617   : > { %v2095_v22 = vpack.c.bf16 %v292_v19, %v291_v61 }
 0x618   : > { %v1485_v2 = vrot.slane %v1471_v7, %v2254_v29  ;;  %v1500_v27 = vrot.slane %v1486_v10, %v2254_v29  ;;  %v1501_v28 = vcombine.low %v1478_v26, %v1493_v11  ;;  %v1502_v40 = vcombine.high %v1478_v26, %v1493_v11  ;;  %v294_v7 = vld [vmem:[%s2702_s4 + $0x98] sm:$0xff] }
 0x619   : > { %v2098_v26 = vpack.c.bf16 %v294_v7, %v293_v24 }
 0x61a   : > { %v1509_v33 = vrot.slane %v1501_v28, %v2259_v32  ;;  %v1516_v8 = vrot.slane %v1502_v40, %v2259_v32  ;;  %v1517_v50 = vcombine.low %v1485_v2, %v1500_v27  ;;  %v1518_v59 = vcombine.high %v1485_v2, %v1500_v27 }
 0x61c   : > { %v1525_v30 = vrot.slane %v1517_v50, %v2259_v32  ;;  %v1532_v55 = vrot.slane %v1518_v59, %v2259_v32  ;;  %v1537_v60 = vcombine.low %v1509_v33, %v1516_v8  ;;  %v1958_v25 = vcombine.high %v1509_v33, %v1516_v8 }
 0x61e   : > { %v1544_v4 = vrot.slane %v1537_v60, %v2254_v29  ;;  %v1552_v17 = vrot.slane %v1958_v25, %v2254_v29  ;;  %v1553_v31 = vcombine.low %v1525_v30, %v1532_v55  ;;  %v1959_v34 = vcombine.high %v1525_v30, %v1532_v55 }
 0x620   : > { %v1560_v35 = vrot.slane %v1553_v31, %v2254_v29  ;;  %v1568_v36 = vrot.slane %v1959_v34, %v2254_v29  ;;  %v1569_v56 = vcombine.low %v1544_v4, %v1552_v17 }
 0x622   : > { %v1577_v38 = vcombine.low %v1560_v35, %v1568_v36  ;;  %v1576_v58 = vrot.slane %v1569_v56, %v2259_v32 }
 0x624   : > { %v1584_v21 = vrot.slane %v1577_v38, %v2259_v32 }
 0x626   : > { %v1586_v23 = vcombine.high %v1576_v58, %v1584_v21  ;;  %v1585_v1 = vcombine.low %v1576_v58, %v1584_v21 }
 0x628   : > { %1588 = vrot.lane.b32.xlu1 %v1586_v23, %s2158_s13 }
 0x62c   : > { %1675 = vrot.lane.b32.xlu1 %v2236_v15, %s2150_s12  ;;  %v279_v15 = vld [vmem:[%s2702_s4 + $0x20] sm:$0xff] }
 0x62d   : > { %v2083_v57 = vpack.c.bf16 %v280_v45, %v279_v15 }
 0x62f   : > { %2084 = vmatpush3.bf16.msra.mxu1 %v2083_v57 }
 0x630   : > { %2085 = vmatprep.subr.bf16.mxu1 %v2147_v6 }
 0x69a   : > { %v1589_v54 = vpop.permute.xlu1 %1588 }
 0x69b   : > { %v1591_v47 = vsel %vm974_vm3, %v1585_v1, %v1589_v54 }
 0x69c   : > { %2038 = vmatmul.mubr.msk.f32.vlgmr.msra.gmra.mrb[2].mxu0 %vm298_vm0, %v1591_v47 }
 0x69d   : > { %2067 = vmatprep.mubr.msk.f32.mxu0 %vm2148_vm1, %v2149_v9  ;;  %v281_v9 = vld [vmem:[%s2702_s4 + $0x30] sm:$0xff]  ;;  %2090 = vmatpush3.bf16.msra.mxu0 %v2089_v14 }
 0x69e   : > { %v1676_v5 = vpop.permute.xlu1 %1675  ;;  %2091 = vmatprep.subr.bf16.mxu0 %v2147_v6 }
 0x6a1   : > { %2093 = vmatpush3.bf16.msra.mxu0 %v2092_v18 }
 0x6a2   : > { %2094 = vmatprep.subr.bf16.mxu0 %v2147_v6 }
 0x6a5   : > { %2096 = vmatpush3.bf16.msra.mxu0 %v2095_v22 }
 0x6a6   : > { %2097 = vmatprep.subr.bf16.mxu0 %v2147_v6 }
 0x6a9   : > { %2099 = vmatpush3.bf16.msra.mxu0 %v2098_v26 }
 0x76f   : > { %v1661_v29 = vpop.f32.mrb[2].mxu0 }
 0x770   : > { %v1665_v53 = vadd.f32 %v1661_v29, %v2208_v0  ;;  %v2039_v32 = vpop.f32.mrb[3].mxu0  ;;  %v282_v0 = vld [vmem:[%s2702_s4 + $0x38] sm:$0xff] }
 0x771   : > { %v2086_v51 = vpack.c.bf16 %v282_v0, %v281_v9 }
 0x772   : > { %v1666_v41 = vmul.f32 %v1665_v53, %v1665_v53 }
 0x773   : > { %2087 = vmatpush3.bf16.msra.mxu1 %v2086_v51 }
 0x774   : > { %v1667_v48 = vsel %vm298_vm0, %v1666_v41, 0.0 }
 0x775   : > { %1668 = vadd.xlane.f32.xlu0 %v1667_v48 }
 0x802   : > { %v1669_v62 = vpop.xlane.xlu0 %1668 }
 0x803   : > { %v1670_v13 = vmul.f32 0.03125, %v1669_v62 }
 0x805   : > { %v1671_v52 = vadd.f32 1e-06, %v1670_v13 }
 0x807   : > { %2133 = vrsqrt.f32 %v1671_v52 }
 0x811   : > { %v2134_v12 = vpop.eup %2133 }
 0x812   : > { %v1673_v37 = vmul.f32 %v2134_v12, %v1665_v53 }
 0x814   : > { %v1678_v16 = vmul.f32 %v1676_v5, %v1673_v37 }
 0x816   : > { %2049 = vmatmul.mubr.msk.f32.vlgmr.msra.gmra.mrb[8].mxu1 %vm298_vm0, %v1678_v16 }
 0x8e9   : > { %v1748_v10 = vpop.f32.mrb[8].mxu1 }
 0x8ea   : > { %1760 = vrot.lane.b32.xlu1 %v1748_v10, %s2157_s19  ;;  %v2050_v11 = vpop.f32.mrb[9].mxu1  ;;  %v1962_v3 = vmul.f32 -1.442695, %v1748_v10  ;;  %s2159_s19 = smov 32  }
 0x8ec   : > { %2135 = vpow2.f32 %v1962_v3 }
 0x8ee   : > { %971 = vrot.lane.b32.xlu1 %v2548_v39, %s2158_s13 }
 0x8f6   : > { %v2136_v49 = vpop.eup %2135 }
 0x8f7   : > { %v1755_v2 = vadd.f32 1.0, %v2136_v49 }
 0x8f9   : > { %2137 = vrcp.f32 %v1755_v2 }
 0x903   : > { %v2138_v27 = vpop.eup %2137 }
 0x904   : > { %v1758_v28 = vmul.f32 %v2138_v27, %v1748_v10 }
 0x95c   : > { %v1761_v40 = vpop.permute.xlu1 %1760 }
 0x95d   : > { %v1763_v33 = vmul.f32 %v1761_v40, %v1758_v28 }
 0x95f   : > { %2068 = vmatmul.mubr.msk.f32.vlgmr.msra.gmra.mrb[4].mxu0 %vm1764_vm4, %v1763_v33 }
 0x960   : > { %v972_v6 = vpop.permute.xlu1 %971 }
 0x961   : > { %v975_v8 = vsel %vm974_vm3, %v2546_v44, %v972_v6 }
 0x962   : > { %1840 = vrot.lane.b32.xlu1 %v975_v8, %s2159_s19 }
 0x9d4   : > { %v1841_v30 = vpop.permute.xlu1 %1840 }
 0xa32   : > { %v1834_v50 = vpop.f32.mrb[4].mxu0 }
 0xa33   : > { %v1838_v39 = vadd.f32 %v1834_v50, %v1665_v53  ;;  %v2069_v59 = vpop.f32.mrb[5].mxu0 }
 0xa35   : > { %v1843_v55 = vsel %vm298_vm0, %v1838_v39, %v1841_v30 }
 0xa36   : > { %v1844_v60 = vsel %vm1764_vm4, %v1843_v55, %v2246_v20 }
 0xa37   : > { %v1846_v25 = vsel %vm1845_vm5, %v1844_v60, 0.0 }
 0xa38   : > { %1847 = vst [vmem:[%s270_s17] sm:$0xff] %v1846_v25 }
 0xa39 PF: > { %s15_s18 = sadd.s32 1, %s2145_s18  }
 0xa3a   : > { %p12_p5 = scmp.ge.s32.totalorder %s15_s18, 4  }
 0xa3c   :  { %14 = sbr.rel (!%p12_p5) target bundleno = 1 (0x1), region = 79 }

</bundles_post_ra>
